<compile_context>
chip_gen: v5e
topology: v5e:2x2
jax: 0.10.0
libtpu: 0.0.40
codegen_flags: <defaults>
</compile_context>

<pallas_src>
import functools

import jax
import jax.numpy as jnp
from jax.experimental import pallas as pl
from jax.experimental.pallas import tpu as pltpu

_SUBLANE = 8
_LANE = 128
# Prefer the widest lane-dense width that divides the flattened size.
_LANE_WIDTHS = (8192, 4096, 2048, 1024, 512, 256, 128)
# Per-block f32 footprint cap (double-buffered 2 f32 + 1 int8 stream ~ <10 MiB).
_MAX_BLOCK_BYTES = 2 * 1024 * 1024


def _round_up(x, m):
    return (x + m - 1) // m * m


def _static_pow(y, gamma):
    """pow with a trace-time exponent; integer gamma -> plain multiplies (no EUP)."""
    g = float(gamma)
    if g.is_integer() and 0 <= g <= 8:
        p = int(g)
        if p == 0:
            return jnp.ones_like(y)
        out = y
        for _ in range(p - 1):
            out = out * y
        return out
    return jnp.power(y, g)


def _focal_kernel(pred_ref, targ_ref, out_ref, *, alpha, gamma, target_is_float):
    x = pred_ref[...]
    t = targ_ref[...]

    # One transcendental family:
    #   log_sigmoid(x)  = -softplus(-x)
    #   log_sigmoid(-x) = log_sigmoid(x) - x
    #   sigmoid(x)      = exp(log_sigmoid(x))
    #   1 - sigmoid(x)  = exp(log_sigmoid(-x))   (avoids cancellation for large x)
    log_sig = jax.nn.log_sigmoid(x)
    log_sig_inv = log_sig - x
    sig = jnp.exp(log_sig)
    one_minus_sig = jnp.exp(log_sig_inv)

    if target_is_float:
        pos = (t == 1.0).astype(x.dtype)
        neg = (t == 0.0).astype(x.dtype)
    else:
        ti = t.astype(jnp.int32)
        pos = (ti == 1).astype(x.dtype)
        neg = (ti == 0).astype(x.dtype)

    pow_pos = _static_pow(one_minus_sig, gamma)   # (1 - sigmoid)^gamma
    pow_neg = _static_pow(sig, gamma)             # sigmoid^gamma

    loss = pos * (alpha * pow_pos) * log_sig \
         + neg * ((1.0 - alpha) * pow_neg) * log_sig_inv
    out_ref[...] = (-loss).astype(out_ref.dtype)


def focal_loss_with_logits_neg_loss(pred, target, *, alpha, gamma):
    """Elementwise focal loss with logits; returns array of pred.shape."""
    orig_shape = pred.shape
    dtype = pred.dtype
    n = int(pred.size)

    pred_flat = pred.reshape(-1)
    # Stream labels narrow (int8) when they are bool/int; keep float targets in
    # their own dtype so exact ==1 / ==0 semantics are preserved.
    if jnp.issubdtype(target.dtype, jnp.bool_) or jnp.issubdtype(target.dtype, jnp.integer):
        targ_flat = target.reshape(-1).astype(jnp.int8)
    else:
        targ_flat = target.reshape(-1)
    target_is_float = jnp.issubdtype(targ_flat.dtype, jnp.floating)

    # Pick a lane-dense width that divides n exactly -> no pad / tail-slice copies.
    width = None
    for w in _LANE_WIDTHS:
        if n % w == 0:
            width = w
            break
    if width is None:
        # TODO(synk): ragged size (n not a multiple of 128) -> single pad-copy fallback.
        width = _LANE
        padded = _round_up(n, width)
        pred_flat = jnp.pad(pred_flat, (0, padded - n))
        pad_val = -1.0 if target_is_float else -1
        targ_flat = jnp.pad(targ_flat, (0, padded - n), constant_values=pad_val)
    else:
        padded = n

    rows = padded // width
    pred2 = pred_flat.reshape(rows, width)
    targ2 = targ_flat.reshape(rows, width)

    # Block rows: multiple of 8 (or the full dim for tiny inputs), capped so one
    # f32 block stays <= ~2 MiB; keep >= 2 grid steps when possible (v7x 2 TCs).
    if rows <= _SUBLANE:
        block_rows = rows
    else:
        max_rows = max(_SUBLANE,
                       (_MAX_BLOCK_BYTES // (width * 4)) // _SUBLANE * _SUBLANE)
        block_rows = min(max_rows, _round_up(rows, _SUBLANE))
        if -(-rows // block_rows) < 2:
            block_rows = max(_SUBLANE, _round_up(-(-rows // 2), _SUBLANE))

    grid = (-(-rows // block_rows),)
    spec = pl.BlockSpec((block_rows, width), lambda i: (i, 0))

    out2 = pl.pallas_call(
        functools.partial(_focal_kernel, alpha=float(alpha), gamma=float(gamma),
                          target_is_float=bool(target_is_float)),
        out_shape=jax.ShapeDtypeStruct((rows, width), dtype),
        grid_spec=pltpu.PrefetchScalarGridSpec(
            num_scalar_prefetch=0,
            grid=grid,
            in_specs=[spec, spec],
            out_specs=spec,
        ),
        compiler_params=pltpu.CompilerParams(
            dimension_semantics=("parallel",),
            vmem_limit_bytes=32 << 20,
        ),
    )(pred2, targ2)

    if padded != n:
        out2 = out2.reshape(-1)[:n]
    return out2.reshape(orig_shape)


def _reference(pred, target, alpha, gamma):
    sig = jax.nn.sigmoid(pred)
    log_sig = jax.nn.log_sigmoid(pred)
    log_sig_inv = jax.nn.log_sigmoid(-pred)
    pos = (target == 1).astype(pred.dtype)
    neg = (target == 0).astype(pred.dtype)
    loss = pos * alpha * jnp.power(1.0 - sig, gamma) * log_sig
    loss = loss + neg * (1.0 - alpha) * jnp.power(sig, gamma) * log_sig_inv
    return -loss


if __name__ == "__main__":
    # Module hyperparameters (deterministic, set in-script).
    alpha = 0.25
    gamma = 2.0

    key = jax.random.PRNGKey(0)
    k_pred, k_targ = jax.random.split(key)

    # NCHW-shaped logits and binary (int8) target.
    pred = jax.random.normal(k_pred, (2, 4, 16, 16), dtype=jnp.float32)
    target = jax.random.bernoulli(k_targ, 0.5, (2, 4, 16, 16)).astype(jnp.int8)

    out = focal_loss_with_logits_neg_loss(pred, target, alpha=alpha, gamma=gamma)
    out = jax.block_until_ready(out)

    ref = _reference(pred, target.astype(jnp.float32), alpha, gamma)
    assert out.shape == pred.shape and out.dtype == pred.dtype
    assert jnp.allclose(out, ref, atol=1e-5, rtol=1e-5), "mismatch vs reference"

    print("KERNEL_OK")
</pallas_src>

<mosaic_0001>
module attributes {stable_mosaic.version = 11 : i64} {
  func.func @_focal_kernel(%arg0: i32, %arg1: memref<1x2048xf32, #tpu.memory_space<vmem>>, %arg2: memref<1x2048xi8, #tpu.memory_space<vmem>>, %arg3: memref<1x2048xf32, #tpu.memory_space<vmem>>) attributes {dimension_semantics = [#tpu.dimension_semantics<parallel>], iteration_bounds = array<i64: 1>, scalar_prefetch = 0 : i64, scratch_operands = 0 : i64, tpu.core_type = #tpu.core_type<tc>, window_params = [{transform_indices = @transform_0, window_bounds = array<i64: 1, 2048>}, {transform_indices = @transform_1, window_bounds = array<i64: 1, 2048>}, {transform_indices = @transform_2, window_bounds = array<i64: 1, 2048>}]} {
    %c0 = arith.constant 0 : index
    %c0_0 = arith.constant 0 : index
    %0 = vector.load %arg1[%c0, %c0_0] : memref<1x2048xf32, #tpu.memory_space<vmem>>, vector<1x2048xf32>
    %c0_1 = arith.constant 0 : index
    %c0_2 = arith.constant 0 : index
    %1 = vector.load %arg2[%c0_1, %c0_2] : memref<1x2048xi8, #tpu.memory_space<vmem>>, vector<1x2048xi8>
    %cst = arith.constant 0.000000e+00 : f32
    %2 = vector.broadcast %cst : f32 to vector<1x2048xf32>
    %3 = arith.subf %2, %0 : vector<1x2048xf32>
    %cst_3 = arith.constant 0.000000e+00 : f32
    %4 = vector.broadcast %cst_3 : f32 to vector<1x2048xf32>
    %5 = arith.maximumf %3, %4 : vector<1x2048xf32>
    %6 = vector.broadcast %cst_3 : f32 to vector<1x2048xf32>
    %7 = arith.subf %3, %6 : vector<1x2048xf32>
    %8 = arith.cmpf one, %7, %7 : vector<1x2048xf32>
    %9 = vector.broadcast %cst_3 : f32 to vector<1x2048xf32>
    %10 = arith.addf %3, %9 : vector<1x2048xf32>
    %11 = math.absf %7 : vector<1x2048xf32>
    %cst_4 = arith.constant 0.000000e+00 : f32
    %12 = vector.broadcast %cst_4 : f32 to vector<1x2048xf32>
    %13 = arith.subf %12, %11 : vector<1x2048xf32>
    %14 = math.exp %13 : vector<1x2048xf32>
    %15 = math.log1p %14 : vector<1x2048xf32>
    %16 = arith.addf %5, %15 : vector<1x2048xf32>
    %17 = arith.select %8, %10, %16 : vector<1x2048xi1>, vector<1x2048xf32>
    %cst_5 = arith.constant 0.000000e+00 : f32
    %18 = vector.broadcast %cst_5 : f32 to vector<1x2048xf32>
    %19 = arith.subf %18, %17 : vector<1x2048xf32>
    %20 = arith.subf %19, %0 : vector<1x2048xf32>
    %21 = math.exp %19 : vector<1x2048xf32>
    %22 = math.exp %20 : vector<1x2048xf32>
    %23 = arith.extsi %1 : vector<1x2048xi8> to vector<1x2048xi32>
    %c1_i32 = arith.constant 1 : i32
    %24 = vector.broadcast %c1_i32 : i32 to vector<1x2048xi32>
    %25 = arith.cmpi eq, %23, %24 : vector<1x2048xi32>
    %26 = arith.extui %25 : vector<1x2048xi1> to vector<1x2048xi32>
    %27 = arith.sitofp %26 : vector<1x2048xi32> to vector<1x2048xf32>
    %c0_i32 = arith.constant 0 : i32
    %28 = vector.broadcast %c0_i32 : i32 to vector<1x2048xi32>
    %29 = arith.cmpi eq, %23, %28 : vector<1x2048xi32>
    %30 = arith.extui %29 : vector<1x2048xi1> to vector<1x2048xi32>
    %31 = arith.sitofp %30 : vector<1x2048xi32> to vector<1x2048xf32>
    %32 = arith.mulf %22, %22 : vector<1x2048xf32>
    %33 = arith.mulf %21, %21 : vector<1x2048xf32>
    %cst_6 = arith.constant 2.500000e-01 : f32
    %34 = vector.broadcast %cst_6 : f32 to vector<1x2048xf32>
    %35 = arith.mulf %34, %32 : vector<1x2048xf32>
    %36 = arith.mulf %27, %35 : vector<1x2048xf32>
    %37 = arith.mulf %36, %19 : vector<1x2048xf32>
    %cst_7 = arith.constant 7.500000e-01 : f32
    %38 = vector.broadcast %cst_7 : f32 to vector<1x2048xf32>
    %39 = arith.mulf %38, %33 : vector<1x2048xf32>
    %40 = arith.mulf %31, %39 : vector<1x2048xf32>
    %41 = arith.mulf %40, %20 : vector<1x2048xf32>
    %42 = arith.addf %37, %41 : vector<1x2048xf32>
    %cst_8 = arith.constant 0.000000e+00 : f32
    %43 = vector.broadcast %cst_8 : f32 to vector<1x2048xf32>
    %44 = arith.subf %43, %42 : vector<1x2048xf32>
    %c0_9 = arith.constant 0 : index
    %c0_10 = arith.constant 0 : index
    %45 = vector.load %arg3[%c0_9, %c0_10] : memref<1x2048xf32, #tpu.memory_space<vmem>>, vector<1x2048xf32>
    tpu.vector_store %arg3[%c0_9, %c0_10], %44 {strides = array<i32>} : memref<1x2048xf32, #tpu.memory_space<vmem>>, vector<1x2048xf32>,
    return
  }
  func.func @transform_0(%arg0: i32) -> (i32, i32) {
    %c0_i32 = arith.constant 0 : i32
    %c0_i32_0 = arith.constant 0 : i32
    return %arg0, %c0_i32 : i32, i32
  }
  func.func @transform_1(%arg0: i32) -> (i32, i32) {
    %c0_i32 = arith.constant 0 : i32
    %c0_i32_0 = arith.constant 0 : i32
    return %arg0, %c0_i32 : i32, i32
  }
  func.func @transform_2(%arg0: i32) -> (i32, i32) {
    %c0_i32 = arith.constant 0 : i32
    %c0_i32_0 = arith.constant 0 : i32
    return %arg0, %c0_i32 : i32, i32
  }
}

</mosaic_0001>

<bundles_post_ra>
// kernel: tpu_custom_call.1
= control target key start
LH: loop header
LB: loop body
LE: loop exit
PB: predicated region body
PF: predicated region fallthrough
CT: control target
= control target key end

     0   :  { %7 = vsyncpa [#allocation3], 0  ;;  %s775_s0 = inlined_call_operand.hbm [shape: f32[1,2048], index: 0, kind: input, shape index: {}]   ;;  %s776_s1 = inlined_call_operand.hbm [shape: s8[1,2048], index: 1, kind: input, shape index: {}]   ;;  %s777_s2 = inlined_call_operand.hbm [shape: f32[1,2048], index: 2, kind: output, shape index: {}]  }
   0x1   :  { %8 = vsyncpa [#allocation6], 0 }
   0x2   :  { %9 = vsyncpa [#allocation4], 0  ;;  %s15_s11 = sshll.u32 %s775_s0, 4  ;;  %s557_s12 = smov [#allocation2]   ;;  %s16_s11 = int_to_ptr.hbm [resolvable:$true] %s15_s11 }
   0x3   :  { %s17_s13 = sshll.u32 %s557_s12, 4  ;;  %s26_s16 = sshll.u32 %s776_s1, 4  ;;  %s18_s13 = int_to_ptr.vmem [resolvable:$true] %s17_s13  ;;  %s27_s16 = int_to_ptr.hbm [resolvable:$true] %s26_s16 }
   0x4   :  { %20 = dma.hbm_to_vmem [thread:$0]  %s16_s11, 256, %s18_s13, [#allocation3]  }
   0x5   :  { %s558_s17 = smov [#allocation5]  }
   0x6   :  { %s28_s18 = sshll.u32 %s558_s17, 4  ;;  %s29_s18 = int_to_ptr.vmem [resolvable:$true] %s28_s18 }
   0x7   :  { %31 = dma.hbm_to_vmem [thread:$0]  %s27_s16, 256, %s29_s18, [#allocation6]  }
   0x8   :  { %551 = dma.done.wait [#allocation3], 256  }
   0x9   :  { %552 = vsyncadd [#allocation3], 4294967040 }
   0xa   :  { %553 = dma.done.wait [#allocation6], 256  }
   0xb   :  { %554 = vsyncadd [#allocation6], 4294967040  ;;  %v40_v0 = vld [vmem:[#allocation2] sm:$0xff]  ;;  %v586_v1 = vld [vmem:[#allocation2 + $0x8] sm:$0xff]  ;;  %v559_v31 = vmov 0.0   ;;  %v560_v48 = vmov 286326784  }
   0xc   :  { %v44_v2 = vsub.f32 0.0, %v40_v0  ;;  %v589_v3 = vsub.f32 0.0, %v586_v1  ;;  %v42_v13 = vld [vmem:[#allocation5] sm:$0xff]  ;;  %v43_v40 = vld [vmem:[#allocation5 + $0x8] sm:$0xff]  ;;  %v159_v49 = vunpack.c.l.s4 %v560_v48  ;;  %v561_v53 = vmov 858989090  }
   0xd   :  { %v94_v17 = vunpack.c.0.s8 %v42_v13  ;;  %v95_v18 = vunpack.c.1.s8 %v42_v13  ;;  %v96_v19 = vunpack.c.2.s8 %v42_v13  ;;  %v97_v20 = vunpack.c.3.s8 %v42_v13  ;;  %s564_s0 = smov [#allocation7]   ;;  %s428_s21 = sshll.u32 %s777_s2, 4  ;;  %s429_s21 = int_to_ptr.hbm [resolvable:$true] %s428_s21 }
   0xe   :  { %v52_v4 = vand.u32 2147483647, %v44_v2  ;;  %v53_v6 = vand.u32 2147483647, %v589_v3  ;;  %v46_v25 = vmax.f32 %v44_v2, 0.0  ;;  %vm48_vm5 = vcmp.ne.f32.partialorder %v44_v2, %v44_v2  ;;  %s426_s1 = sshll.u32 %s564_s0, 4  ;;  %s427_s1 = int_to_ptr.vmem [resolvable:$true] %s426_s1 }
   0xf   :  { %vm102_vm1 = vcmp.eq.s32.totalorder %v94_v17, 1  ;;  %vm103_vm2 = vcmp.eq.s32.totalorder %v95_v18, 1  ;;  %vm104_vm3 = vcmp.eq.s32.totalorder %v96_v19, 1  ;;  %vm105_vm4 = vcmp.eq.s32.totalorder %v97_v20, 1 }
  0x10   :  { %v54_v5 = vsub.f32 0.0, %v52_v4  ;;  %v55_v8 = vsub.f32 0.0, %v53_v6  ;;  %v593_v32 = vsel %vm102_vm1, 1.0, %v559_v31  ;;  %v47_v33 = vmax.f32 %v589_v3, 0.0 }
  0x11   :  { %vm49_vm6 = vcmp.ne.f32.partialorder %v589_v3, %v589_v3  ;;  %v599_v34 = vsel %vm103_vm2, 1.0, %v559_v31  ;;  %v602_v35 = vsel %vm104_vm3, 1.0, %v559_v31  ;;  %v605_v36 = vsel %vm105_vm4, 1.0, %v559_v31 }
  0x12   :  { %v56_v7 = vmul.f32 1.442695, %v54_v5  ;;  %v58_v9 = vmul.f32 1.442695, %v55_v8  ;;  %vm607_vm7 = vcmp.eq.s32.totalorder %v94_v17, 0  ;;  %vm613_vm8 = vcmp.eq.s32.totalorder %v95_v18, 0 }
  0x13   :  { %vm621_vm10 = vcmp.eq.s32.totalorder %v96_v19, 0  ;;  %vm625_vm11 = vcmp.eq.s32.totalorder %v97_v20, 0  ;;  %v98_v52 = vunpack.c.0.s8 %v43_v40  ;;  %v163_v54 = vunpack.c.l.s4 %v561_v53 }
  0x14   :  { %463 = vpow2.f32 %v56_v7  ;;  %v99_v56 = vunpack.c.1.s8 %v43_v40  ;;  %v100_v57 = vunpack.c.2.s8 %v43_v40  ;;  %v562_v59 = vmov 1431651396  }
  0x15   :  { %465 = vpow2.f32 %v58_v9  ;;  %v167_v60 = vunpack.c.l.s4 %v562_v59  ;;  %v101_v61 = vunpack.c.3.s8 %v43_v40  ;;  %v447_v62 = vsel %vm607_vm7, 1.0, %v559_v31 }
  0x16   :  { %v448_v63 = vsel %vm613_vm8, 1.0, %v559_v31  ;;  %v449_v5 = vsel %vm621_vm10, 1.0, %v559_v31  ;;  %v450_v6 = vsel %vm625_vm11, 1.0, %v559_v31  ;;  %vm106_vm12 = vcmp.eq.s32.totalorder %v98_v52, 1 }
  0x17   :  { %v648_v7 = vunpack.c.0.s8 %v159_v49  ;;  %vm107_vm13 = vcmp.eq.s32.totalorder %v99_v56, 1  ;;  %vm108_vm14 = vcmp.eq.s32.totalorder %v100_v57, 1  ;;  %v654_v9 = vunpack.c.0.s8 %v163_v54 }
  0x18   :  { %vm109_vm15 = vcmp.eq.s32.totalorder %v101_v61, 1  ;;  %v663_v13 = vsel %vm106_vm12, 1.0, %v559_v31  ;;  %vm131_vm1 = vcmp.eq.s32.totalorder %v99_v56, 0  ;;  %v674_v17 = vsel %vm108_vm14, 1.0, %v559_v31 }
  0x19   :  { %v677_v19 = vsel %vm109_vm15, 1.0, %v559_v31  ;;  %vm679_vm2 = vcmp.eq.s32.totalorder %v100_v57, 0  ;;  %vm683_vm3 = vcmp.eq.s32.totalorder %v101_v61, 0  ;;  %vm396_vm4 = vcmask 1040384  }
  0x1a   :  { %v464_v10 = vpop.eup %463  ;;  %vm402_vm7 = vcmask 1044484   ;;  %vm404_vm8 = vcmask 1046534   ;;  %vm408_vm10 = vcmask 1043456  }
  0x1b   :  { %v60_v11 = vadd.f32 1.0, %v464_v10  ;;  %v63_v12 = vmul.f32 -0.5, %v464_v10  ;;  %v66_v15 = vand.u32 2147483647, %v464_v10  ;;  %v466_v16 = vpop.eup %465 }
  0x1c   :  { %v69_v21 = vadd.f32 1.0, %v466_v16  ;;  %v72_v22 = vmul.f32 -0.5, %v466_v16  ;;  %v75_v29 = vand.u32 2147483647, %v466_v16 }
  0x1d   :  { %467 = vlog2.f32 %v60_v11  ;;  %v64_v14 = vadd.f32 1.0, %v63_v12  ;;  %vm67_vm0 = vcmp.lt.f32.partialorder %v66_v15, 0.0004427343 }
  0x1e   :  { %469 = vlog2.f32 %v69_v21  ;;  %v73_v27 = vadd.f32 1.0, %v72_v22  ;;  %vm617_vm9 = vcmp.lt.f32.partialorder %v75_v29, 0.0004427343 }
  0x1f   :  { %v65_v23 = vmul.f32 %v464_v10, %v64_v14  ;;  %v656_v10 = vunpack.c.0.s8 %v167_v60 }
  0x20   :  { %v74_v41 = vmul.f32 %v466_v16, %v73_v27  ;;  %v671_v16 = vsel %vm107_vm13, 1.0, %v559_v31 }
  0x23   :  { %v468_v24 = vpop.eup %467 }
  0x24   :  { %v62_v26 = vmul.f32 0.6931472, %v468_v24  ;;  %v470_v37 = vpop.eup %469 }
  0x25   :  { %v71_v44 = vmul.f32 0.6931472, %v470_v37 }
  0x26   :  { %v68_v28 = vsel %vm67_vm0, %v65_v23, %v62_v26  ;;  %vm130_vm0 = vcmp.eq.s32.totalorder %v98_v52, 0 }
  0x27   :  { %v78_v30 = vadd.f32 %v68_v28, %v46_v25  ;;  %v77_v55 = vsel %vm617_vm9, %v74_v41, %v71_v44  ;;  %v691_v24 = vsel %vm130_vm0, 1.0, %v559_v31  ;;  %v694_v25 = vsel %vm131_vm1, 1.0, %v559_v31 }
  0x28   :  { %v79_v4 = vadd.f32 %v77_v55, %v47_v33  ;;  %vm406_vm9 = vcmask 1045508  }
  0x29   :  { %v80_v38 = vsel %vm48_vm5, %v44_v2, %v78_v30  ;;  %vm398_vm5 = vcmask 1042434  }
  0x2a   :  { %v611_v42 = vsub.f32 0.0, %v80_v38  ;;  %v81_v8 = vsel %vm49_vm6, %v589_v3, %v79_v4  ;;  %vm400_vm6 = vcmask 1041408  }
  0x2b   :  { %v658_v11 = vsub.f32 0.0, %v81_v8 }
  0x2c   :  { %v630_v50 = vsub.f32 %v611_v42, %v40_v0  ;;  %v86_v51 = vmul.f32 1.442695, %v611_v42  ;;  %v563_v0 = vmov 2004313702   ;;  %v211_v22 = vperm.slane %v611_v42, %v648_v7 }
  0x2d   :  { %v171_v2 = vunpack.c.l.s4 %v563_v0  ;;  %v667_v3 = vsub.f32 %v658_v11, %v586_v1  ;;  %v88_v15 = vmul.f32 1.442695, %v658_v11  ;;  %v215_v27 = vperm.slane %v611_v42, %v654_v9 }
  0x2e   :  { %471 = vpow2.f32 %v86_v51  ;;  %v90_v58 = vmul.f32 1.442695, %v630_v50  ;;  %v219_v29 = vperm.slane %v611_v42, %v656_v10  ;;  %v313_v33 = vperm.slane %v630_v50, %v648_v7 }
  0x2f   :  { %v660_v12 = vunpack.c.0.s8 %v171_v2  ;;  %v92_v23 = vmul.f32 1.442695, %v667_v3  ;;  %v317_v43 = vperm.slane %v630_v50, %v654_v9  ;;  %v321_v44 = vperm.slane %v630_v50, %v656_v10 }
  0x30   :  { %473 = vpow2.f32 %v90_v58  ;;  %v235_v20 = vperm.slane %v658_v11, %v656_v10 }
  0x31   :  { %475 = vpow2.f32 %v88_v15  ;;  %v223_v30 = vperm.slane %v611_v42, %v660_v12  ;;  %v325_v42 = vperm.slane %v630_v50, %v660_v12 }
  0x32   :  { %477 = vpow2.f32 %v92_v23 }
  0x34   :  { %v472_v14 = vpop.eup %471 }
  0x35   :  { %v152_v18 = vmul.f32 %v472_v14, %v472_v14 }
  0x36   :  { %v474_v1 = vpop.eup %473 }
  0x37   :  { %v150_v26 = vmul.f32 %v474_v1, %v474_v1  ;;  %v256_v28 = vmul.f32 0.75, %v152_v18  ;;  %v476_v54 = vpop.eup %475  ;;  %v231_v1 = vperm.slane %v658_v11, %v654_v9 }
  0x38   :  { %v478_v58 = vpop.eup %477  ;;  %v153_v15 = vmul.f32 %v476_v54, %v476_v54 }
  0x39   :  { %v154_v37 = vmul.f32 0.25, %v150_v26  ;;  %v263_v38 = vperm.slane %v256_v28, %v648_v7  ;;  %v267_v39 = vperm.slane %v256_v28, %v654_v9  ;;  %v271_v40 = vperm.slane %v256_v28, %v656_v10 }
  0x3a   :  { %v275_v41 = vperm.slane %v256_v28, %v660_v12 }
  0x3b   :  { %v161_v45 = vperm.slane %v154_v37, %v648_v7  ;;  %v165_v46 = vperm.slane %v154_v37, %v654_v9  ;;  %v169_v47 = vperm.slane %v154_v37, %v656_v10  ;;  %v173_v48 = vperm.slane %v154_v37, %v660_v12 }
  0x3c   :  { %v300_v49 = vmul.f32 %v447_v62, %v263_v38  ;;  %v301_v51 = vmul.f32 %v448_v63, %v267_v39  ;;  %v302_v52 = vmul.f32 %v449_v5, %v271_v40  ;;  %v303_v53 = vmul.f32 %v450_v6, %v275_v41 }
  0x3d   :  { %v198_v55 = vmul.f32 %v593_v32, %v161_v45  ;;  %v199_v56 = vmul.f32 %v599_v34, %v165_v46  ;;  %v200_v50 = vmul.f32 %v602_v35, %v169_v47  ;;  %v201_v57 = vmul.f32 %v605_v36, %v173_v48 }
  0x3e   :  { %v350_v59 = vmul.f32 %v313_v33, %v300_v49  ;;  %v351_v60 = vmul.f32 %v317_v43, %v301_v51  ;;  %v352_v61 = vmul.f32 %v321_v44, %v302_v52  ;;  %v353_v62 = vmul.f32 %v325_v42, %v303_v53 }
  0x3f   :  { %v248_v63 = vmul.f32 %v211_v22, %v198_v55  ;;  %v249_v0 = vmul.f32 %v215_v27, %v199_v56  ;;  %v250_v2 = vmul.f32 %v219_v29, %v200_v50  ;;  %v251_v4 = vmul.f32 %v223_v30, %v201_v57 }
  0x40   :  { %v453_v32 = vsel %vm679_vm2, 1.0, %v559_v31  ;;  %v454_v34 = vsel %vm683_vm3, 1.0, %v559_v31  ;;  %v151_v35 = vmul.f32 %v478_v58, %v478_v58  ;;  %v227_v36 = vperm.slane %v658_v11, %v648_v7 }
  0x41   :  { %v358_v5 = vadd.f32 %v350_v59, %v248_v63  ;;  %v359_v6 = vadd.f32 %v351_v60, %v249_v0  ;;  %v360_v8 = vadd.f32 %v352_v61, %v250_v2  ;;  %v361_v14 = vadd.f32 %v353_v62, %v251_v4 }
  0x42   :  { %v155_v18 = vmul.f32 0.25, %v151_v35  ;;  %v257_v43 = vmul.f32 0.75, %v153_v15  ;;  %v239_v46 = vperm.slane %v658_v11, %v660_v12  ;;  %v333_v50 = vperm.slane %v667_v3, %v654_v9 }
  0x43   :  { %v366_v22 = vsub.f32 0.0, %v358_v5  ;;  %v367_v23 = vsub.f32 0.0, %v359_v6  ;;  %v368_v21 = vsub.f32 0.0, %v360_v8  ;;  %v369_v31 = vsub.f32 0.0, %v361_v14 }
  0x44   :  { %v177_v26 = vperm.slane %v155_v18, %v648_v7  ;;  %v181_v27 = vperm.slane %v155_v18, %v654_v9  ;;  %v185_v28 = vperm.slane %v155_v18, %v656_v10  ;;  %v189_v29 = vperm.slane %v155_v18, %v660_v12 }
  0x45   :  { %v382_v30 = vrot.slane %v366_v22, 3  ;;  %v383_v33 = vrot.slane %v367_v23, 6  ;;  %v384_v37 = vrot.slane %v367_v23, 1  ;;  %v385_v38 = vrot.slane %v368_v21, 4 }
  0x46   :  { %v386_v39 = vrot.slane %v368_v21, 7  ;;  %v387_v40 = vrot.slane %v369_v31, 2  ;;  %v388_v41 = vrot.slane %v369_v31, 5  ;;  %v202_v45 = vmul.f32 %v663_v13, %v177_v26 }
  0x47   :  { %v397_v44 = vsel %vm396_vm4, %v366_v22, %v382_v30  ;;  %v399_v42 = vsel %vm398_vm5, %v383_v33, %v384_v37  ;;  %v203_v51 = vmul.f32 %v671_v16, %v181_v27  ;;  %v204_v53 = vmul.f32 %v674_v17, %v185_v28 }
  0x48   :  { %v401_v47 = vsel %vm400_vm6, %v397_v44, %v399_v42  ;;  %v403_v48 = vsel %vm402_vm7, %v385_v38, %v386_v39  ;;  %v405_v49 = vsel %vm404_vm8, %v387_v40, %v388_v41  ;;  %v205_v54 = vmul.f32 %v677_v19, %v189_v29 }
  0x49   :  { %v407_v52 = vsel %vm406_vm9, %v403_v48, %v405_v49  ;;  %v329_v13 = vperm.slane %v667_v3, %v648_v7  ;;  %v279_v11 = vperm.slane %v257_v43, %v648_v7  ;;  %v283_v56 = vperm.slane %v257_v43, %v654_v9 }
  0x4a   :  { %v409_v55 = vsel %vm408_vm10, %v401_v47, %v407_v52  ;;  %v287_v16 = vperm.slane %v257_v43, %v656_v10  ;;  %v291_v57 = vperm.slane %v257_v43, %v660_v12  ;;  %v337_v17 = vperm.slane %v667_v3, %v656_v10 }
  0x4b   :  { %419 = vst [vmem:[#allocation7] sm:$0xff] %v409_v55  ;;  %v341_v19 = vperm.slane %v667_v3, %v660_v12  ;;  %v252_v58 = vmul.f32 %v227_v36, %v202_v45  ;;  %v253_v59 = vmul.f32 %v231_v1, %v203_v51  ;;  %v304_v7 = vmul.f32 %v691_v24, %v279_v11 }
  0x4c   :  { %v305_v60 = vmul.f32 %v694_v25, %v283_v56  ;;  %v254_v61 = vmul.f32 %v235_v20, %v204_v53  ;;  %v255_v62 = vmul.f32 %v239_v46, %v205_v54  ;;  %v306_v9 = vmul.f32 %v453_v32, %v287_v16 }
  0x4d   :  { %v307_v63 = vmul.f32 %v454_v34, %v291_v57  ;;  %v354_v0 = vmul.f32 %v329_v13, %v304_v7 }
  0x4e   :  { %v355_v2 = vmul.f32 %v333_v50, %v305_v60  ;;  %v356_v4 = vmul.f32 %v337_v17, %v306_v9 }
  0x4f   :  { %v357_v35 = vmul.f32 %v341_v19, %v307_v63  ;;  %v362_v5 = vadd.f32 %v354_v0, %v252_v58 }
  0x50   :  { %v363_v6 = vadd.f32 %v355_v2, %v253_v59  ;;  %v364_v10 = vadd.f32 %v356_v4, %v254_v61 }
  0x51   :  { %v365_v8 = vadd.f32 %v357_v35, %v255_v62  ;;  %v370_v14 = vsub.f32 0.0, %v362_v5 }
  0x52   :  { %v371_v12 = vsub.f32 0.0, %v363_v6  ;;  %v372_v3 = vsub.f32 0.0, %v364_v10 }
  0x53   :  { %v373_v36 = vsub.f32 0.0, %v365_v8  ;;  %v389_v15 = vrot.slane %v370_v14, 3 }
  0x54   :  { %v390_v24 = vrot.slane %v371_v12, 6  ;;  %v391_v18 = vrot.slane %v371_v12, 1  ;;  %v392_v25 = vrot.slane %v372_v3, 4  ;;  %v393_v1 = vrot.slane %v372_v3, 7 }
  0x55   :  { %v394_v20 = vrot.slane %v373_v36, 2  ;;  %v395_v32 = vrot.slane %v373_v36, 5  ;;  %v410_v34 = vsel %vm396_vm4, %v370_v14, %v389_v15 }
  0x56   :  { %v411_v22 = vsel %vm398_vm5, %v390_v24, %v391_v18  ;;  %v413_v21 = vsel %vm402_vm7, %v392_v25, %v393_v1 }
  0x57   :  { %v412_v23 = vsel %vm400_vm6, %v410_v34, %v411_v22  ;;  %v414_v31 = vsel %vm404_vm8, %v394_v20, %v395_v32 }
  0x58   :  { %v415_v26 = vsel %vm406_vm9, %v413_v21, %v414_v31 }
  0x59   :  { %v416_v27 = vsel %vm408_vm10, %v412_v23, %v415_v26 }
  0x5a   :  { %420 = vst [vmem:[#allocation7 + $0x8] sm:$0xff] %v416_v27 }
  0x5b   :  { %431 = dma.vmem_to_hbm [thread:$0]  %s427_s1, 256, %s429_s21, [#allocation4]  }
  0x5c   :  { %555 = dma.done.wait [#allocation4], 256  }
  0x5d   :  { %556 = vsyncadd [#allocation4], 4294967040 }
  0x5e   :  { %436 = vsyncpa [#allocation3], 1 }
  0x5f   :  { %437 = vsyncpa [#allocation6], 1 }
  0x60   :  { %438 = vsyncpa [#allocation4], 1 }

</bundles_post_ra>
